<compile_context>
chip_gen: v7x
topology: tpu7x:2x2x1
jax: 0.10.0
libtpu: 0.0.40
codegen_flags: <defaults>
</compile_context>

<pallas_src>
import functools
import math

import numpy as np
import jax
import jax.numpy as jnp
from jax.experimental import pallas as pl
from jax.experimental.pallas import tpu as pltpu

_EPS = 1e-5                     # GroupNorm default eps
_SQRT_HALF = 0.7071067811865476


def _erf_poly(x):
  # Abramowitz & Stegun 7.1.26 rational approximation, |abs err| <= 1.5e-7.
  # TODO(synk): lax.erf lowering in Mosaic is not guaranteed, so exact-erf GELU
  # is realized with this ~1e-7-accurate polynomial erf instead.
  a1, a2, a3, a4, a5 = (0.254829592, -0.284496736, 1.421413741,
                        -1.453152027, 1.061405429)
  p = 0.3275911
  sign = jnp.where(x >= 0.0, 1.0, -1.0)
  z = jnp.abs(x)
  # Divide pushed to the EUP slot (otherwise idle) instead of the VALU.
  t = pl.reciprocal(1.0 + p * z, approx=True)
  poly = ((((a5 * t + a4) * t + a3) * t + a2) * t + a1) * t
  return sign * (1.0 - poly * jnp.exp(-z * z))


def _gelu_exact(x):
  # Kept in f32 on all generations (v5e has no bf16 VALU/EUP); only the MXU
  # matmul operands go bf16.
  return 0.5 * x * (1.0 + _erf_poly(x * _SQRT_HALF))


def _poolformer_block_kernel(x_ref, pw_ref, cp_ref, c1_ref, w1_ref, w2_ref,
                             o_ref, *, width, block_b):
  hw = x_ref.shape[-1]
  c = x_ref.shape[-2]
  inv_n = 1.0 / float(c * hw)

  # Pool helper rows: edge masks (applied at the destination pixel) and the
  # per-pixel 1/valid-count map.  Each row is (1, HW) and sublane-broadcasts
  # over the C channels.  Loaded/hoisted once, outside the sample loop.
  pw = pw_ref[...]
  m_l, m_r = pw[0:1, :], pw[1:2, :]          # left / right neighbor valid
  m_u, m_d = pw[2:3, :], pw[3:4, :]          # up   / down  neighbor valid
  inv_cnt = pw[4:5, :]                       # 1 / count (count_include_pad=False)

  # Packed per-channel parameters, each a (C, 1) column broadcasting over HW.
  cp = cp_ref[...]
  a1 = cp[:, 0:1]                            # ls1 * g1 (norm1 affine folded away)
  g2, b2 = cp[:, 1:2], cp[:, 2:3]
  ls2, c2 = cp[:, 3:4], cp[:, 4:5]

  c1 = c1_ref[...]                           # (CH, 1) fc1 bias, f32
  w1 = w1_ref[...]                           # (CH, C) fc1 weight, bf16
  w2 = w2_ref[...]                           # (C, CH) fc2 weight, bf16

  # scf.for over samples: bounds vreg live ranges to ONE sample's intermediates
  # (the Python-unroll version kept block_b copies of the (CH, HW) GELU tile
  # live simultaneously -> spills).
  @pl.loop(0, block_b)
  def _(i):
    x = x_ref[i]                             # (C, HW) float32

    # ---- token-mixer branch ------------------------------------------------
    # Pool(GN1(x)) - GN1(x) == inv1*g1 * (Pool(x) - x); mean and b1 cancel.
    s = jnp.sum(x)
    ss = jnp.sum(x * x)
    mean = s * inv_n
    var = ss * inv_n - mean * mean
    inv1 = jax.lax.rsqrt(var + _EPS)

    # Separable 3x3 neighbor sum via lane rotations + edge masks.  Rolls wrap
    # circularly, but every wrapped position is exactly an invalid neighbor
    # and is zeroed by the corresponding mask.
    s1 = (x
          + m_l * pltpu.roll(x, shift=1, axis=1)             # x[p-1]
          + m_r * pltpu.roll(x, shift=hw - 1, axis=1))        # x[p+1]
    s2 = (s1
          + m_u * pltpu.roll(s1, shift=width, axis=1)         # row above
          + m_d * pltpu.roll(s1, shift=hw - width, axis=1))   # row below
    x1 = x + (a1 * inv1) * (s2 * inv_cnt - x)

    # ---- MLP branch: x1 + ls2 * fc2(GELU(fc1(norm2(x1)))) ------------------
    s2_ = jnp.sum(x1)
    ss2 = jnp.sum(x1 * x1)
    mean2 = s2_ * inv_n
    var2 = ss2 * inv_n - mean2 * mean2
    inv2 = jax.lax.rsqrt(var2 + _EPS)
    y2 = (x1 - mean2) * (inv2 * g2) + b2

    # bf16 MXU matmuls with f32 accumulation (3-4x the f32 MXU rate).
    h = jnp.dot(w1, y2.astype(jnp.bfloat16),
                preferred_element_type=jnp.float32) + c1      # (CH, HW) f32
    h = _gelu_exact(h)
    # NOTE: for production HW (e.g. 56x56=3136) with block_b>1 the (CH, HW)
    # tile could additionally be chunked over the lane axis to cut peak VMEM;
    # at the sizes selected by _choose_block_b it fits comfortably.
    m = jnp.dot(w2, h.astype(jnp.bfloat16),
                preferred_element_type=jnp.float32) + c2      # (C, HW) f32

    o_ref[i] = x1 + ls2 * m


@functools.lru_cache(maxsize=None)
def _pool_weights(H, W):
  # O(HW) host-side constant, built once per (H, W) thanks to the cache.
  # Rows: m_left, m_right, m_up, m_down, 1/count, padded to 8 sublanes.
  HW = H * W
  idx = np.arange(HW)
  h, w = idx // W, idx % W
  pw = np.zeros((8, HW), np.float32)
  pw[0] = (w >= 1)
  pw[1] = (w <= W - 2)
  pw[2] = (h >= 1)
  pw[3] = (h <= H - 2)
  cnt = ((np.minimum(h + 1, H - 1) - np.maximum(h - 1, 0) + 1) *
         (np.minimum(w + 1, W - 1) - np.maximum(w - 1, 0) + 1)).astype(np.float32)
  pw[4] = 1.0 / cnt
  return pw


def _vmem_limit_bytes():
  # Generation-aware scoped-VMEM limit: half the physical capacity when the
  # query is available (v5e/v6e: 128 MiB -> 64 MiB, v7x: 64 MiB -> 32 MiB),
  # otherwise the conservative 32 MiB default.
  try:
    cap = int(pltpu.get_tpu_info().vmem_capacity_bytes)
    return max(32 << 20, min(64 << 20, cap // 2))
  except Exception:
    return 32 << 20


def _choose_block_b(B, C, CH, HW, vmem_limit_bytes):
  # Samples per grid step.  Budgeted against the REAL live set:
  #   - double-buffered input + output blocks: 4 * block_b * C * HW * 4 bytes
  #   - one sample's in-flight intermediates (pl.loop bounds live ranges):
  #     x/s1/x1/y2/out in f32 plus the (CH, HW) GELU tile (f32 + bf16 copy)
  #   - the tiny constant-index inputs (double-buffered).
  # Must divide B exactly (per-sample GroupNorm stats must never see padding).
  per_sample = (6 * C + 3 * CH) * HW * 4
  const_bytes = 2 * (8 * HW + 8 * C + CH + 2 * CH * C) * 4

  def fits(bb):
    io_blocks = 4 * bb * C * HW * 4
    return io_blocks + per_sample + const_bytes <= int(0.6 * vmem_limit_bytes)

  divisors = [d for d in range(1, B + 1) if B % d == 0 and fits(d)] or [1]
  # Prefer an EVEN grid_b >= 2 (balanced work for v7x's 2 TensorCores under
  # "parallel" semantics), then any grid_b >= 2, then the largest block.
  even = [d for d in divisors if (B // d) >= 2 and (B // d) % 2 == 0]
  multi = [d for d in divisors if (B // d) >= 2]
  if even:
    return max(even)
  if multi:
    return max(multi)
  return max(divisors)


@jax.jit
def poolformer_block(x_nchw, params):
  B, C, H, W = x_nchw.shape
  HW = H * W
  CH = params["w1"].shape[0]

  x = x_nchw.reshape(B, C, HW).astype(jnp.float32)   # free: NCHW is channel-major
  pw = jnp.asarray(_pool_weights(H, W))              # (8, HW)

  # Pack the per-channel vectors into a single (C, 8) array -> one tiny DMA.
  # norm1's g1 is folded with ls1 (b1/mean cancel algebraically in the pooling
  # residual, see kernel comment).
  zeros = jnp.zeros((C,), jnp.float32)
  cparams = jnp.stack(
      [(params["ls1"] * params["g1"]).reshape(C),
       params["g2"].reshape(C), params["b2"].reshape(C),
       params["ls2"].reshape(C), params["c2"].reshape(C),
       zeros, zeros, zeros], axis=1).astype(jnp.float32)
  c1 = params["c1"].reshape(CH, 1).astype(jnp.float32)
  # MXU matmuls run in bf16 (f32 accumulation); cast the weights once here.
  w1 = params["w1"].astype(jnp.bfloat16)              # (CH, C)
  w2 = params["w2"].astype(jnp.bfloat16)              # (C, CH)

  vmem_limit = _vmem_limit_bytes()
  block_b = _choose_block_b(B, C, CH, HW, vmem_limit)
  grid_b = B // block_b
  kernel = functools.partial(_poolformer_block_kernel, width=W, block_b=block_b)

  out = pl.pallas_call(
      kernel,
      out_shape=jax.ShapeDtypeStruct((B, C, HW), jnp.float32),
      grid=(grid_b,),
      in_specs=[
          pl.BlockSpec((block_b, C, HW), lambda b: (b, 0, 0)),   # x (lane-dense)
          pl.BlockSpec((8, HW), lambda b: (0, 0)),               # pool masks + 1/count
          pl.BlockSpec((C, 8), lambda b: (0, 0)),                # packed per-channel params
          pl.BlockSpec((CH, 1), lambda b: (0, 0)),               # fc1 bias (f32)
          pl.BlockSpec((CH, C), lambda b: (0, 0)),               # fc1 weight (bf16)
          pl.BlockSpec((C, CH), lambda b: (0, 0)),               # fc2 weight (bf16)
      ],
      out_specs=pl.BlockSpec((block_b, C, HW), lambda b: (b, 0, 0)),
      compiler_params=pltpu.CompilerParams(
          dimension_semantics=("parallel",),
          vmem_limit_bytes=vmem_limit),
  )(x, pw, cparams, c1, w1, w2)

  return out.reshape(B, C, H, W)


def init_params(key, dim, mlp_ratio=4.0):
  # Shapes follow PoolFormerBlock.__init__ (dim=C, hidden=int(dim*mlp_ratio)).
  # Values are synthetic but deterministic (random instead of ones/zeros/1e-5
  # so every term of the forward pass is exercised non-trivially).
  hidden = int(dim * mlp_ratio)
  ks = jax.random.split(key, 10)
  f32 = jnp.float32
  return {
      "g1": 1.0 + 0.1 * jax.random.normal(ks[0], (dim,), f32),
      "b1": 0.1 * jax.random.normal(ks[1], (dim,), f32),
      "g2": 1.0 + 0.1 * jax.random.normal(ks[2], (dim,), f32),
      "b2": 0.1 * jax.random.normal(ks[3], (dim,), f32),
      "ls1": 0.5 + 0.1 * jax.random.normal(ks[4], (dim,), f32),
      "ls2": 0.5 + 0.1 * jax.random.normal(ks[5], (dim,), f32),
      # 1x1-conv MLP weights in PyTorch conv layout (out, in):
      "w1": 0.02 * jax.random.normal(ks[6], (hidden, dim), f32),   # fc1: C -> CH
      "c1": 0.02 * jax.random.normal(ks[7], (hidden,), f32),
      "w2": 0.02 * jax.random.normal(ks[8], (dim, hidden), f32),   # fc2: CH -> C
      "c2": 0.02 * jax.random.normal(ks[9], (dim,), f32),
  }


_np_erf = np.vectorize(math.erf)


def reference_numpy(x, p):
  # Straightforward float64 NumPy re-implementation of the PyTorch forward
  # (uses the ORIGINAL unfused parameters, so it also validates the norm1
  # algebraic fusion done in the kernel).
  x = np.asarray(x, np.float64)
  g1 = np.asarray(p["g1"], np.float64).reshape(1, -1, 1, 1)
  b1 = np.asarray(p["b1"], np.float64).reshape(1, -1, 1, 1)
  g2 = np.asarray(p["g2"], np.float64).reshape(1, -1, 1, 1)
  b2 = np.asarray(p["b2"], np.float64).reshape(1, -1, 1, 1)
  ls1 = np.asarray(p["ls1"], np.float64).reshape(1, -1, 1, 1)
  ls2 = np.asarray(p["ls2"], np.float64).reshape(1, -1, 1, 1)
  w1 = np.asarray(p["w1"], np.float64)                       # (CH, C)
  c1 = np.asarray(p["c1"], np.float64).reshape(1, -1, 1, 1)
  w2 = np.asarray(p["w2"], np.float64)                       # (C, CH)
  c2 = np.asarray(p["c2"], np.float64).reshape(1, -1, 1, 1)

  def gn(v, g, b):
    mean = v.mean(axis=(1, 2, 3), keepdims=True)
    var = ((v - mean) ** 2).mean(axis=(1, 2, 3), keepdims=True)
    return (v - mean) / np.sqrt(var + _EPS) * g + b

  def avgpool3(v):
    B, C, H, W = v.shape
    out = np.zeros_like(v)
    for hh in range(H):
      for ww in range(W):
        h0, h1 = max(hh - 1, 0), min(hh + 1, H - 1)
        w0, w1 = max(ww - 1, 0), min(ww + 1, W - 1)
        out[:, :, hh, ww] = v[:, :, h0:h1 + 1, w0:w1 + 1].mean(axis=(2, 3))
    return out

  y1 = gn(x, g1, b1)
  x1 = x + ls1 * (avgpool3(y1) - y1)
  y2 = gn(x1, g2, b2)
  h = np.einsum("bchw,dc->bdhw", y2, w1) + c1
  h = 0.5 * h * (1.0 + _np_erf(h / math.sqrt(2.0)))
  m = np.einsum("bdhw,cd->bchw", h, w2) + c2
  return x1 + ls2 * m


if __name__ == "__main__":
  B, C, H, W = 2, 4, 16, 16          # dim=4, mlp_ratio=4 -> hidden=16
  key = jax.random.PRNGKey(0)
  kx, kp = jax.random.split(key)
  x = jax.random.normal(kx, (B, C, H, W), jnp.float32)
  params = init_params(kp, C, mlp_ratio=4.0)

  out = poolformer_block(x, params)
  out = jax.block_until_ready(out)
  assert out.shape == (B, C, H, W) and out.dtype == jnp.float32

  ref = reference_numpy(np.asarray(x), {k: np.asarray(v) for k, v in params.items()})
  # Loose tolerance: bf16 MXU matmuls + EUP approx-reciprocal inside the erf GELU.
  np.testing.assert_allclose(np.asarray(out), ref, rtol=1e-2, atol=1e-2)
  print("KERNEL_OK")
</pallas_src>

<mosaic_0001>
module attributes {stable_mosaic.version = 11 : i64} {
  func.func @_poolformer_block_kernel(%arg0: i32, %arg1: memref<1x4x256xf32, #tpu.memory_space<vmem>>, %arg2: memref<8x256xf32, #tpu.memory_space<vmem>>, %arg3: memref<4x8xf32, #tpu.memory_space<vmem>>, %arg4: memref<16x1xf32, #tpu.memory_space<vmem>>, %arg5: memref<16x4xbf16, #tpu.memory_space<vmem>>, %arg6: memref<4x16xbf16, #tpu.memory_space<vmem>>, %arg7: memref<1x4x256xf32, #tpu.memory_space<vmem>>) attributes {dimension_semantics = [#tpu.dimension_semantics<parallel>], iteration_bounds = array<i64: 2>, scalar_prefetch = 0 : i64, scratch_operands = 0 : i64, tpu.core_type = #tpu.core_type<tc>, window_params = [{transform_indices = @transform_0, window_bounds = array<i64: 1, 4, 256>}, {pipeline_mode = #tpu.pipeline_mode<synchronous>, transform_indices = @transform_1, window_bounds = array<i64: 8, 256>}, {pipeline_mode = #tpu.pipeline_mode<synchronous>, transform_indices = @transform_2, window_bounds = array<i64: 4, 8>}, {pipeline_mode = #tpu.pipeline_mode<synchronous>, transform_indices = @transform_3, window_bounds = array<i64: 16, 1>}, {pipeline_mode = #tpu.pipeline_mode<synchronous>, transform_indices = @transform_4, window_bounds = array<i64: 16, 4>}, {pipeline_mode = #tpu.pipeline_mode<synchronous>, transform_indices = @transform_5, window_bounds = array<i64: 4, 16>}, {transform_indices = @transform_6, window_bounds = array<i64: 1, 4, 256>}]} {
    %c0 = arith.constant 0 : index
    %c0_0 = arith.constant 0 : index
    %0 = vector.load %arg2[%c0, %c0_0] : memref<8x256xf32, #tpu.memory_space<vmem>>, vector<8x256xf32>
    %1 = vector.extract_strided_slice %0 {offsets = [0, 0], sizes = [1, 256], strides = [1, 1]} : vector<8x256xf32> to vector<1x256xf32>
    %2 = vector.extract_strided_slice %0 {offsets = [1, 0], sizes = [1, 256], strides = [1, 1]} : vector<8x256xf32> to vector<1x256xf32>
    %3 = vector.extract_strided_slice %0 {offsets = [2, 0], sizes = [1, 256], strides = [1, 1]} : vector<8x256xf32> to vector<1x256xf32>
    %4 = vector.extract_strided_slice %0 {offsets = [3, 0], sizes = [1, 256], strides = [1, 1]} : vector<8x256xf32> to vector<1x256xf32>
    %5 = vector.extract_strided_slice %0 {offsets = [4, 0], sizes = [1, 256], strides = [1, 1]} : vector<8x256xf32> to vector<1x256xf32>
    %c0_1 = arith.constant 0 : index
    %c0_2 = arith.constant 0 : index
    %6 = vector.load %arg3[%c0_1, %c0_2] : memref<4x8xf32, #tpu.memory_space<vmem>>, vector<4x8xf32>
    %7 = vector.extract_strided_slice %6 {offsets = [0, 0], sizes = [4, 1], strides = [1, 1]} : vector<4x8xf32> to vector<4x1xf32>
    %8 = vector.extract_strided_slice %6 {offsets = [0, 1], sizes = [4, 1], strides = [1, 1]} : vector<4x8xf32> to vector<4x1xf32>
    %9 = vector.extract_strided_slice %6 {offsets = [0, 2], sizes = [4, 1], strides = [1, 1]} : vector<4x8xf32> to vector<4x1xf32>
    %10 = vector.extract_strided_slice %6 {offsets = [0, 3], sizes = [4, 1], strides = [1, 1]} : vector<4x8xf32> to vector<4x1xf32>
    %11 = vector.extract_strided_slice %6 {offsets = [0, 4], sizes = [4, 1], strides = [1, 1]} : vector<4x8xf32> to vector<4x1xf32>
    %c0_3 = arith.constant 0 : index
    %c0_4 = arith.constant 0 : index
    %12 = vector.load %arg4[%c0_3, %c0_4] : memref<16x1xf32, #tpu.memory_space<vmem>>, vector<16x1xf32>
    %c0_5 = arith.constant 0 : index
    %c0_6 = arith.constant 0 : index
    %13 = vector.load %arg5[%c0_5, %c0_6] : memref<16x4xbf16, #tpu.memory_space<vmem>>, vector<16x4xbf16>
    %c0_7 = arith.constant 0 : index
    %c0_8 = arith.constant 0 : index
    %14 = vector.load %arg6[%c0_7, %c0_8] : memref<4x16xbf16, #tpu.memory_space<vmem>>, vector<4x16xbf16>
    %c0_i32 = arith.constant 0 : i32
    %c1_i32 = arith.constant 1 : i32
    %15 = arith.muli %c0_i32, %c1_i32 : i32
    %c0_i32_9 = arith.constant 0 : i32
    %16 = arith.addi %c0_i32_9, %15 : i32
    %17 = arith.index_cast %16 : i32 to index
    %c0_10 = arith.constant 0 : index
    %c0_11 = arith.constant 0 : index
    %18 = vector.load %arg1[%17, %c0_10, %c0_11] : memref<1x4x256xf32, #tpu.memory_space<vmem>>, vector<1x4x256xf32>
    %19 = vector.shape_cast %18 : vector<1x4x256xf32> to vector<4x256xf32>
    %20 = vector.shape_cast %19 : vector<4x256xf32> to vector<1x4x256xf32>
    %cst = arith.constant dense<0.000000e+00> : vector<1xf32>
    %21 = vector.multi_reduction <add>, %20, %cst [1, 2] : vector<1x4x256xf32> to vector<1xf32>
    %22 = vector.shape_cast %21 : vector<1xf32> to vector<1x1x1xf32>
    %23 = vector.extract %22[0, 0, 0] : f32 from vector<1x1x1xf32>
    %24 = arith.mulf %19, %19 : vector<4x256xf32>
    %25 = vector.shape_cast %24 : vector<4x256xf32> to vector<1x4x256xf32>
    %cst_12 = arith.constant dense<0.000000e+00> : vector<1xf32>
    %26 = vector.multi_reduction <add>, %25, %cst_12 [1, 2] : vector<1x4x256xf32> to vector<1xf32>
    %27 = vector.shape_cast %26 : vector<1xf32> to vector<1x1x1xf32>
    %28 = vector.extract %27[0, 0, 0] : f32 from vector<1x1x1xf32>
    %cst_13 = arith.constant 9.765625E-4 : f32
    %29 = arith.mulf %23, %cst_13 : f32
    %cst_14 = arith.constant 9.765625E-4 : f32
    %30 = arith.mulf %28, %cst_14 : f32
    %31 = arith.mulf %29, %29 : f32
    %32 = arith.subf %30, %31 : f32
    %cst_15 = arith.constant 9.99999974E-6 : f32
    %33 = arith.addf %32, %cst_15 : f32
    %34 = math.rsqrt %33 : f32
    %c1_i32_16 = arith.constant 1 : i32
    %35 = tpu.dynamic_rotate %19 by %c1_i32_16 dim 1 : vector<4x256xf32>, i32 -> vector<4x256xf32>
    %36 = vector.broadcast %1 : vector<1x256xf32> to vector<4x256xf32>
    %37 = arith.mulf %36, %35 : vector<4x256xf32>
    %38 = arith.addf %19, %37 : vector<4x256xf32>
    %c255_i32 = arith.constant 255 : i32
    %39 = tpu.dynamic_rotate %19 by %c255_i32 dim 1 : vector<4x256xf32>, i32 -> vector<4x256xf32>
    %40 = vector.broadcast %2 : vector<1x256xf32> to vector<4x256xf32>
    %41 = arith.mulf %40, %39 : vector<4x256xf32>
    %42 = arith.addf %38, %41 : vector<4x256xf32>
    %c16_i32 = arith.constant 16 : i32
    %43 = tpu.dynamic_rotate %42 by %c16_i32 dim 1 : vector<4x256xf32>, i32 -> vector<4x256xf32>
    %44 = vector.broadcast %3 : vector<1x256xf32> to vector<4x256xf32>
    %45 = arith.mulf %44, %43 : vector<4x256xf32>
    %46 = arith.addf %42, %45 : vector<4x256xf32>
    %c240_i32 = arith.constant 240 : i32
    %47 = tpu.dynamic_rotate %42 by %c240_i32 dim 1 : vector<4x256xf32>, i32 -> vector<4x256xf32>
    %48 = vector.broadcast %4 : vector<1x256xf32> to vector<4x256xf32>
    %49 = arith.mulf %48, %47 : vector<4x256xf32>
    %50 = arith.addf %46, %49 : vector<4x256xf32>
    %51 = vector.broadcast %34 : f32 to vector<4x1xf32>
    %52 = arith.mulf %7, %51 : vector<4x1xf32>
    %53 = vector.broadcast %5 : vector<1x256xf32> to vector<4x256xf32>
    %54 = arith.mulf %50, %53 : vector<4x256xf32>
    %55 = arith.subf %54, %19 : vector<4x256xf32>
    %56 = vector.broadcast %52 : vector<4x1xf32> to vector<4x256xf32>
    %57 = arith.mulf %56, %55 : vector<4x256xf32>
    %58 = arith.addf %19, %57 : vector<4x256xf32>
    %59 = vector.shape_cast %58 : vector<4x256xf32> to vector<1x4x256xf32>
    %cst_17 = arith.constant dense<0.000000e+00> : vector<1xf32>
    %60 = vector.multi_reduction <add>, %59, %cst_17 [1, 2] : vector<1x4x256xf32> to vector<1xf32>
    %61 = vector.shape_cast %60 : vector<1xf32> to vector<1x1x1xf32>
    %62 = vector.extract %61[0, 0, 0] : f32 from vector<1x1x1xf32>
    %63 = arith.mulf %58, %58 : vector<4x256xf32>
    %64 = vector.shape_cast %63 : vector<4x256xf32> to vector<1x4x256xf32>
    %cst_18 = arith.constant dense<0.000000e+00> : vector<1xf32>
    %65 = vector.multi_reduction <add>, %64, %cst_18 [1, 2] : vector<1x4x256xf32> to vector<1xf32>
    %66 = vector.shape_cast %65 : vector<1xf32> to vector<1x1x1xf32>
    %67 = vector.extract %66[0, 0, 0] : f32 from vector<1x1x1xf32>
    %cst_19 = arith.constant 9.765625E-4 : f32
    %68 = arith.mulf %62, %cst_19 : f32
    %cst_20 = arith.constant 9.765625E-4 : f32
    %69 = arith.mulf %67, %cst_20 : f32
    %70 = arith.mulf %68, %68 : f32
    %71 = arith.subf %69, %70 : f32
    %cst_21 = arith.constant 9.99999974E-6 : f32
    %72 = arith.addf %71, %cst_21 : f32
    %73 = math.rsqrt %72 : f32
    %74 = vector.broadcast %68 : f32 to vector<4x256xf32>
    %75 = arith.subf %58, %74 : vector<4x256xf32>
    %76 = vector.broadcast %73 : f32 to vector<4x1xf32>
    %77 = arith.mulf %76, %8 : vector<4x1xf32>
    %78 = vector.broadcast %77 : vector<4x1xf32> to vector<4x256xf32>
    %79 = arith.mulf %75, %78 : vector<4x256xf32>
    %80 = vector.broadcast %9 : vector<4x1xf32> to vector<4x256xf32>
    %81 = arith.addf %79, %80 : vector<4x256xf32>
    %82 = arith.truncf %81 : vector<4x256xf32> to vector<4x256xbf16>
    %cst_22 = arith.constant dense<0.000000e+00> : vector<16x256xf32>
    %83 = tpu.matmul %13, %82, %cst_22 {dimension_numbers = #tpu.dot_dimension_numbers<[1], [0], [0], [1], [0, 0, 1, 1], [], []>} : vector<16x4xbf16>, vector<4x256xbf16>, vector<16x256xf32> -> vector<16x256xf32>
    %84 = vector.broadcast %12 : vector<16x1xf32> to vector<16x256xf32>
    %85 = arith.addf %83, %84 : vector<16x256xf32>
    %cst_23 = arith.constant 5.000000e-01 : f32
    %86 = vector.broadcast %cst_23 : f32 to vector<16x256xf32>
    %87 = arith.mulf %86, %85 : vector<16x256xf32>
    %cst_24 = arith.constant 0.707106769 : f32
    %88 = vector.broadcast %cst_24 : f32 to vector<16x256xf32>
    %89 = arith.mulf %85, %88 : vector<16x256xf32>
    %cst_25 = arith.constant 0.000000e+00 : f32
    %90 = vector.broadcast %cst_25 : f32 to vector<16x256xf32>
    %91 = arith.cmpf oge, %89, %90 : vector<16x256xf32>
    %cst_26 = arith.constant 1.000000e+00 : f32
    %cst_27 = arith.constant -1.000000e+00 : f32
    %92 = vector.broadcast %cst_26 : f32 to vector<16x256xf32>
    %93 = vector.broadcast %cst_27 : f32 to vector<16x256xf32>
    %94 = arith.select %91, %92, %93 : vector<16x256xi1>, vector<16x256xf32>
    %95 = math.absf %89 : vector<16x256xf32>
    %cst_28 = arith.constant 0.327591091 : f32
    %96 = vector.broadcast %cst_28 : f32 to vector<16x256xf32>
    %97 = arith.mulf %96, %95 : vector<16x256xf32>
    %cst_29 = arith.constant 1.000000e+00 : f32
    %98 = vector.broadcast %cst_29 : f32 to vector<16x256xf32>
    %99 = arith.addf %98, %97 : vector<16x256xf32>
    %100 = tpu.reciprocal %99 {approx = true} : vector<16x256xf32> -> vector<16x256xf32>
    %cst_30 = arith.constant 1.06140542 : f32
    %101 = vector.broadcast %cst_30 : f32 to vector<16x256xf32>
    %102 = arith.mulf %101, %100 : vector<16x256xf32>
    %cst_31 = arith.constant -1.45315206 : f32
    %103 = vector.broadcast %cst_31 : f32 to vector<16x256xf32>
    %104 = arith.addf %102, %103 : vector<16x256xf32>
    %105 = arith.mulf %104, %100 : vector<16x256xf32>
    %cst_32 = arith.constant 1.42141378 : f32
    %106 = vector.broadcast %cst_32 : f32 to vector<16x256xf32>
    %107 = arith.addf %105, %106 : vector<16x256xf32>
    %108 = arith.mulf %107, %100 : vector<16x256xf32>
    %cst_33 = arith.constant -0.284496725 : f32
    %109 = vector.broadcast %cst_33 : f32 to vector<16x256xf32>
    %110 = arith.addf %108, %109 : vector<16x256xf32>
    %111 = arith.mulf %110, %100 : vector<16x256xf32>
    %cst_34 = arith.constant 0.254829586 : f32
    %112 = vector.broadcast %cst_34 : f32 to vector<16x256xf32>
    %113 = arith.addf %111, %112 : vector<16x256xf32>
    %114 = arith.mulf %113, %100 : vector<16x256xf32>
    %cst_35 = arith.constant 0.000000e+00 : f32
    %115 = vector.broadcast %cst_35 : f32 to vector<16x256xf32>
    %116 = arith.subf %115, %95 : vector<16x256xf32>
    %117 = arith.mulf %116, %95 : vector<16x256xf32>
    %118 = math.exp %117 : vector<16x256xf32>
    %119 = arith.mulf %114, %118 : vector<16x256xf32>
    %cst_36 = arith.constant 1.000000e+00 : f32
    %120 = vector.broadcast %cst_36 : f32 to vector<16x256xf32>
    %121 = arith.subf %120, %119 : vector<16x256xf32>
    %122 = arith.mulf %94, %121 : vector<16x256xf32>
    %cst_37 = arith.constant 1.000000e+00 : f32
    %123 = vector.broadcast %cst_37 : f32 to vector<16x256xf32>
    %124 = arith.addf %123, %122 : vector<16x256xf32>
    %125 = arith.mulf %87, %124 : vector<16x256xf32>
    %126 = arith.truncf %125 : vector<16x256xf32> to vector<16x256xbf16>
    %cst_38 = arith.constant dense<0.000000e+00> : vector<4x256xf32>
    %127 = tpu.matmul %14, %126, %cst_38 {dimension_numbers = #tpu.dot_dimension_numbers<[1], [0], [0], [1], [0, 0, 1, 1], [], []>} : vector<4x16xbf16>, vector<16x256xbf16>, vector<4x256xf32> -> vector<4x256xf32>
    %128 = vector.broadcast %11 : vector<4x1xf32> to vector<4x256xf32>
    %129 = arith.addf %127, %128 : vector<4x256xf32>
    %130 = vector.broadcast %10 : vector<4x1xf32> to vector<4x256xf32>
    %131 = arith.mulf %130, %129 : vector<4x256xf32>
    %132 = arith.addf %58, %131 : vector<4x256xf32>
    %133 = arith.index_cast %16 : i32 to index
    %c0_39 = arith.constant 0 : index
    %c0_40 = arith.constant 0 : index
    %134 = vector.load %arg7[%133, %c0_39, %c0_40] : memref<1x4x256xf32, #tpu.memory_space<vmem>>, vector<1x4x256xf32>
    %135 = vector.shape_cast %134 : vector<1x4x256xf32> to vector<4x256xf32>
    %136 = vector.shape_cast %132 : vector<4x256xf32> to vector<1x4x256xf32>
    tpu.vector_store %arg7[%133, %c0_39, %c0_40], %136 {strides = array<i32>} : memref<1x4x256xf32, #tpu.memory_space<vmem>>, vector<1x4x256xf32>,
    %c1_i32_41 = arith.constant 1 : i32
    return
  }
  func.func @transform_0(%arg0: i32) -> (i32, i32, i32) {
    %c0_i32 = arith.constant 0 : i32
    %c0_i32_0 = arith.constant 0 : i32
    %c0_i32_1 = arith.constant 0 : i32
    return %arg0, %c0_i32, %c0_i32_0 : i32, i32, i32
  }
  func.func @transform_1(%arg0: i32) -> (i32, i32) {
    %c0_i32 = arith.constant 0 : i32
    %c0_i32_0 = arith.constant 0 : i32
    %c0_i32_1 = arith.constant 0 : i32
    return %c0_i32, %c0_i32_0 : i32, i32
  }
  func.func @transform_2(%arg0: i32) -> (i32, i32) {
    %c0_i32 = arith.constant 0 : i32
    %c0_i32_0 = arith.constant 0 : i32
    %c0_i32_1 = arith.constant 0 : i32
    return %c0_i32, %c0_i32_0 : i32, i32
  }
  func.func @transform_3(%arg0: i32) -> (i32, i32) {
    %c0_i32 = arith.constant 0 : i32
    %c0_i32_0 = arith.constant 0 : i32
    %c0_i32_1 = arith.constant 0 : i32
    return %c0_i32, %c0_i32_0 : i32, i32
  }
  func.func @transform_4(%arg0: i32) -> (i32, i32) {
    %c0_i32 = arith.constant 0 : i32
    %c0_i32_0 = arith.constant 0 : i32
    %c0_i32_1 = arith.constant 0 : i32
    return %c0_i32, %c0_i32_0 : i32, i32
  }
  func.func @transform_5(%arg0: i32) -> (i32, i32) {
    %c0_i32 = arith.constant 0 : i32
    %c0_i32_0 = arith.constant 0 : i32
    %c0_i32_1 = arith.constant 0 : i32
    return %c0_i32, %c0_i32_0 : i32, i32
  }
  func.func @transform_6(%arg0: i32) -> (i32, i32, i32) {
    %c0_i32 = arith.constant 0 : i32
    %c0_i32_0 = arith.constant 0 : i32
    %c0_i32_1 = arith.constant 0 : i32
    return %arg0, %c0_i32, %c0_i32_0 : i32, i32, i32
  }
}

</mosaic_0001>

<bundles_post_ra>
// kernel: poolformer_block.1
= control target key start
LH: loop header
LB: loop body
LE: loop exit
PB: predicated region body
PF: predicated region fallthrough
CT: control target
= control target key end

     0   :  { %s922_s21 = smov 0   ;;  %s1067_s0 = inlined_call_operand.vmem [shape: f32[2,4,256], index: 0, kind: input, shape index: {}]   ;;  %s1068_s1 = inlined_call_operand.vmem [shape: f32[8,256], index: 1, kind: input, shape index: {}]   ;;  %s1069_s2 = inlined_call_operand.vmem [shape: f32[4,8], index: 2, kind: input, shape index: {}]   ;;  %s1070_s3 = inlined_call_operand.vmem [shape: f32[16,1], index: 3, kind: input, shape index: {}]   ;;  %s1071_s4 = inlined_call_operand.vmem [shape: bf16[16,4], index: 4, kind: input, shape index: {}]   ;;  %s1072_s5 = inlined_call_operand.vmem [shape: bf16[4,16], index: 5, kind: input, shape index: {}]   ;;  %s1073_s6 = inlined_call_operand.vmem [shape: f32[2,4,256], index: 6, kind: output, shape index: {}]  }
   0x1 LB: > { %s791_s22 = sadd.s32 4294967295, %s874_s21   ;;  %p795_p0 = scmp.ge.s32.totalorder %s874_s21, 1  ;;  %s874_s21 = sphi %s922_s21, %s16_s21  }
   0x2   : > { %p212_p1 = scmp.lt.s32.totalorder %s874_s21, 3 }
   0x4   : > { %p213_p2 = pnand %p795_p0, %p212_p1 }
   0x5   : > { %p242_p3 = scmp.lt.s32.totalorder (!%p213_p2), %s791_s22, 1  ;;  %vm265_vm0 = vcmask (!%p213_p2), 1043456   ;;  %s876_s27 = smov (!%p213_p2), 1   ;;  %v306_v10 = vlaneseq (!%p213_p2)  ;;  %v959_v15 = vld [vmem:[%s1068_s1] sm:$0xff] (!%p213_p2)  ;;  %v964_v16 = vld [vmem:[%s1068_s1 + $0x8] sm:$0xff] (!%p213_p2)  ;;  %v878_v42 = vmov (!%p213_p2), 0  }
   0x6   : > { %216 = sbr.rel (%p213_p2) target bundleno = 1352 (0x548), region = 44  ;;  %s877_s28 = smov (!%p213_p2), 127   ;;  %839 = vset.pattern.permute.xlu1 (!%p213_p2), %v878_v42  ;;  %558 = vmatprep.mubr.bf16.mxu0 (!%p213_p2), %v878_v42  ;;  %v980_v55 = vld [vmem:[%s1069_s2] sm:$0xf] (!%p213_p2)  ;;  %vm519_vm5 = vcmask (!%p213_p2), 1041408   ;;  %vm515_vm6 = vcmask (!%p213_p2), 31744  }
   0x7   : > { %v951_v11 = vshrl.u32 (!%p213_p2), %v306_v10, 7  ;;  %v953_v13 = vand.u32 (!%p213_p2), 127, %v306_v10  ;;  %715 = vmatprep.mubr.bf16.mxu1 (!%p213_p2), %v878_v42  ;;  %s879_s9 = smov (!%p213_p2), 16   ;;  %s880_s10 = smov (!%p213_p2), 112   ;;  %vm679_vm11 = vcmask (!%p213_p2), 130048  }
   0x9   : > { %v313_v14 = vsub.s32 (!%p213_p2), 0, %v951_v11  ;;  %vm308_vm1 = vcmp.lt.s32.totalorder (!%p213_p2), %v953_v13, 1  ;;  %v335_v26 = vsub.s32 (!%p213_p2), 1, %v951_v11  ;;  %vm330_vm2 = vcmp.lt.s32.totalorder (!%p213_p2), %v953_v13, 127 }
   0xa   : > { %v360_v61 = vsub.s32 (!%p213_p2), 2, %v951_v11  ;;  %vm355_vm3 = vcmp.lt.s32.totalorder (!%p213_p2), %v953_v13, 16  ;;  %v382_v62 = vsub.s32 (!%p213_p2), 3, %v951_v11  ;;  %vm377_vm4 = vcmp.lt.s32.totalorder (!%p213_p2), %v953_v13, 112 }
   0xb   : > { %v314_v17 = vrot.slane (!%p213_p2), %v959_v15, %v313_v14  ;;  %v318_v18 = vrot.slane (!%p213_p2), %v964_v16, %v313_v14  ;;  %v336_v33 = vrot.slane (!%p213_p2), %v959_v15, %v335_v26  ;;  %v340_v34 = vrot.slane (!%p213_p2), %v964_v16, %v335_v26 }
   0xc   : > { %v361_v63 = vrot.slane (!%p213_p2), %v959_v15, %v360_v61 }
   0xd   : > { %s1075_s22 = smov (!%p242_p3, %s791_s22), 1 }
   0xe   : > { %s806_s23 = sshll.u32 %s1075_s22, 3 }
   0xf   : > { %s246_s26 = scalar_lea.vmem %s1067_s0, %s806_s23  ;;  %s251_s18 = scalar_lea.vmem %s1073_s6, %s806_s23 }
  0x10   : > { %v938_v0 = vld [vmem:[%s246_s26] sm:$0xff] }
  0x11   : > { %v263_v1 = vcombine.high %v938_v0, %v938_v0  ;;  %v266_v2 = vsel %vm265_vm0, %v938_v0, 0.0  ;;  %v278_v3 = vmul.f32 %v938_v0, %v938_v0  ;;  %302 = vrot.lane.b32.xlu1 %v938_v0, %s876_s27 }
  0x13   : > { %v267_v4 = vsel %vm265_vm0, %v263_v1, 0.0  ;;  %v280_v5 = vcombine.high %v278_v3, %v278_v3  ;;  %v282_v6 = vsel %vm265_vm0, %v278_v3, 0.0 }
  0x14   : > { %v268_v7 = vadd.f32 %v267_v4, %v266_v2 }
  0x15   : > { %v283_v8 = vsel %vm265_vm0, %v280_v5, 0.0  ;;  %304 = vrot.lane.b32.xlu1 %v263_v1, %s876_s27  ;;  %v383_v5 = vrot.slane %v959_v15, %v382_v62 }
  0x16   : > { %269 = vadd.xlane.f32.xlu0 %v268_v7  ;;  %v284_v9 = vadd.f32 %v283_v8, %v282_v6  ;;  %v387_v6 = vrot.slane %v964_v16, %v382_v62 }
  0x19   : > { %328 = vrot.lane.b32.xlu1 %v263_v1, %s877_s28  ;;  %v365_v1 = vrot.slane %v964_v16, %v360_v61  ;;  %v883_v61 = vmov 839922192  }
  0x1a   : > { %285 = vadd.xlane.f32.xlu0 %v284_v9  ;;  %v474_v62 = vunpack.c.l.s4 %v883_v61 }
  0x30   : > { %326 = vrot.lane.b32.xlu0 %v938_v0, %s877_s28 }
  0x83   : > { %v303_v12 = vpop.permute.xlu1 %302 }
  0x87   : > { %v305_v19 = vpop.permute.xlu1 %304 }
  0x88   : > { %v309_v20 = vsel %vm308_vm1, %v303_v12, %v305_v19  ;;  %v310_v21 = vsel %vm308_vm1, %v305_v19, %v303_v12 }
  0x89   : > { %v319_v24 = vmul.f32 %v314_v17, %v310_v21  ;;  %v320_v25 = vmul.f32 %v318_v18, %v309_v20  ;;  %v399_v17 = vsub.s32 4, %v951_v11 }
  0x8b   : > { %v323_v31 = vcombine.low %v319_v24, %v320_v25  ;;  %v329_v32 = vpop.permute.xlu1 %328  ;;  %v400_v20 = vrot.slane %v959_v15, %v399_v17  ;;  %v404_v13 = vrot.slane %v964_v16, %v399_v17 }
  0x8d   : > { %v325_v43 = vadd.f32 %v323_v31, %v938_v0 }
  0xa3   : > { %v270_v22 = vpop.xlane.xlu0 %269 }
  0xa4   : > { %v271_v23 = vrot.slane %v270_v22, 4 }
  0xa6   : > { %v272_v27 = vadd.f32 %v271_v23, %v270_v22  ;;  %v407_v23 = vcombine.low %v400_v20, %v404_v13 }
  0xa7   : > { %v286_v28 = vpop.xlane.xlu0 %285 }
  0xa8   : > { %v273_v29 = vrot.slane %v272_v27, 2  ;;  %v287_v30 = vrot.slane %v286_v28, 4 }
  0xaa   : > { %v288_v35 = vadd.f32 %v287_v30, %v286_v28  ;;  %v274_v36 = vadd.f32 %v273_v29, %v272_v27 }
  0xab   : > { %v327_v37 = vpop.permute.xlu0 %326 }
  0xac   : > { %v289_v38 = vrot.slane %v288_v35, 2  ;;  %v331_v39 = vsel %vm330_vm2, %v327_v37, %v329_v32  ;;  %v332_v40 = vsel %vm330_vm2, %v329_v32, %v327_v37  ;;  %v275_v41 = vrot.slane %v274_v36, 1 }
  0xad   : > { %v341_v44 = vmul.f32 %v336_v33, %v331_v39  ;;  %v342_v45 = vmul.f32 %v340_v34, %v332_v40 }
  0xae   : > { %v276_v46 = vadd.f32 %v275_v41, %v274_v36  ;;  %v290_v47 = vadd.f32 %v289_v38, %v288_v35 }
  0xaf   : > { %v345_v48 = vcombine.low %v341_v44, %v342_v45 }
  0xb0   : > { %808 = vpush %v276_v46  ;;  %v291_v49 = vrot.slane %v290_v47, 1 }
  0xb1   : > { %v347_v50 = vadd.f32 %v345_v48, %v325_v43  ;;  %v881_v48 = vmov 1  }
  0xb2   : > { %v292_v51 = vadd.f32 %v291_v49, %v290_v47  ;;  %840 = vset.pattern.permute.xlu0 %v881_v48 }
  0xb3   : > { %351 = vrot.lane.b32.xlu1 %v347_v50, %s879_s9  ;;  %v349_v52 = vcombine.high %v347_v50, %v347_v50 }
  0xb4   : > { %810 = vpush %v292_v51  ;;  %v882_v51 = vmov 2  }
  0xb7   : > { %373 = vrot.lane.b32.xlu1 %v347_v50, %s880_s10 }
  0xbb   : > { %353 = vrot.lane.b32.xlu1 %v349_v52, %s879_s9 }
  0xbf   : > { %375 = vrot.lane.b32.xlu1 %v349_v52, %s880_s10 }
  0xe1   : > { %s809_s11 = spop %808 }
  0xe2   : > { %s294_s12 = smul.f32 0.0009765625, %s809_s11 }
  0xe4   : > { %s296_s13 = smul.f32 %s294_s12, %s294_s12 }
  0xe5   : > { %s811_s14 = spop %810 }
  0xe6   : > { %s295_s15 = smul.f32 0.0009765625, %s811_s14 }
  0xe8   : > { %s297_s16 = ssub.f32 %s295_s15, %s296_s13 }
  0xea   : > { %s298_s17 = sadd.f32 1e-05, %s297_s16 }
  0xec   : > { %v299_v53 = vstv %s298_s17 }
  0xed   : > { %848 = vrsqrt.f32 %v299_v53 }
  0xf7   : > { %v849_v54 = vpop.eup %848 }
  0xf8   : > { %812 = vpush %v849_v54 }
 0x125   : > { %v352_v58 = vpop.permute.xlu1 %351 }
 0x129   : > { %s813_s20 = spop %812  ;;  %v374_v59 = vpop.permute.xlu1 %373 }
 0x12a   : > { %v395_v56 = vstv %s813_s20 }
 0x12b   : > { %v396_v57 = vmul.f32 %v395_v56, %v980_v55 }
 0x12d   : > { %413 = vperm.xlu1 %839, %v396_v57   ;;  %v354_v60 = vpop.permute.xlu1 %353 }
 0x12e   : > { %v356_v3 = vsel %vm355_vm3, %v352_v58, %v354_v60  ;;  %v357_v4 = vsel %vm355_vm3, %v354_v60, %v352_v58  ;;  %v257_v60 = vld [vmem:[%s1070_s3 + $0x8] sm:$0xff] }
 0x12f   : > { %v366_v9 = vmul.f32 %v361_v63, %v357_v4  ;;  %v367_v10 = vmul.f32 %v365_v1, %v356_v3  ;;  %v475_v63 = vunpack.c.0.s8 %v474_v62 }
 0x131   : > { %v376_v2 = vpop.permute.xlu1 %375  ;;  %v370_v18 = vcombine.low %v366_v9, %v367_v10  ;;  %841 = vset.pattern.permute.xlu1 %v882_v51  ;;  %v478_v1 = vsub.s32 %v475_v63, %v951_v11  ;;  %v884_v11 = vmov 4  }
 0x132   : > { %v378_v7 = vsel %vm377_vm4, %v374_v59, %v376_v2  ;;  %v379_v8 = vsel %vm377_vm4, %v376_v2, %v374_v59 }
 0x133   : > { %v388_v12 = vmul.f32 %v383_v5, %v378_v7  ;;  %v389_v14 = vmul.f32 %v387_v6, %v379_v8  ;;  %v372_v21 = vadd.f32 %v370_v18, %v347_v50  ;;  %v847_v18 = vld [vmem:[%s1071_s4] sm:$0xff]  }
 0x135   : > { %v392_v19 = vcombine.low %v388_v12, %v389_v14 }
 0x137   : > { %v394_v22 = vadd.f32 %v392_v19, %v372_v21  ;;  %v885_v19 = vmov 3  }
 0x139   : > { %v409_v24 = vmul.f32 %v407_v23, %v394_v22 }
 0x13b   : > { %v410_v25 = vsub.f32 %v409_v24, %v938_v0 }
 0x13d   : > { %v417_v26 = vcombine.high %v410_v25, %v410_v25 }
 0x1ac   : > { %v414_v27 = vpop.permute.xlu1 %413 }
 0x1ad   : > { %v419_v28 = vmul.f32 %v414_v27, %v410_v25  ;;  %v420_v29 = vmul.f32 %v417_v26, %v414_v27 }
 0x1af   : > { %v423_v30 = vcombine.low %v419_v28, %v420_v29 }
 0x1b1   : > { %v996_v31 = vadd.f32 %v423_v30, %v938_v0 }
 0x1b3   : > { %v427_v32 = vcombine.high %v996_v31, %v996_v31  ;;  %v441_v15 = vmul.f32 %v996_v31, %v996_v31  ;;  %v429_v16 = vsel %vm265_vm0, %v996_v31, 0.0 }
 0x1b5   : > { %v430_v33 = vsel %vm265_vm0, %v427_v32, 0.0  ;;  %v443_v34 = vcombine.high %v441_v15, %v441_v15  ;;  %v445_v36 = vsel %vm265_vm0, %v441_v15, 0.0 }
 0x1b6   : > { %v431_v35 = vadd.f32 %v430_v33, %v429_v16 }
 0x1b7   : > { %v446_v37 = vsel %vm265_vm0, %v443_v34, 0.0 }
 0x1b8   : > { %432 = vadd.xlane.f32.xlu0 %v431_v35  ;;  %v447_v0 = vadd.f32 %v446_v37, %v445_v36 }
 0x1ba   : > { %448 = vadd.xlane.f32.xlu1 %v447_v0 }
 0x1cb   : > { %484 = vperm.xlu1 %841, %v980_v55  }
 0x1cf   : > { %842 = vset.pattern.permute.xlu1 %v878_v42  ;;  %v256_v42 = vld [vmem:[%s1070_s3] sm:$0xff] }
 0x1d0   : > { %502 = vperm.xlu1 %842, %v256_v42  }
 0x1d4   : > { %507 = vperm.xlu1 %842, %v257_v60  }
 0x1d8   : > { %843 = vset.pattern.permute.xlu1 %v884_v11 }
 0x1d9   : > { %676 = vperm.xlu1 %843, %v980_v55  }
 0x1dd   : > { %844 = vset.pattern.permute.xlu1 %v885_v19 }
 0x1de   : > { %725 = vperm.xlu1 %844, %v980_v55  }
 0x245   : > { %v433_v38 = vpop.xlane.xlu0 %432 }
 0x246   : > { %v434_v39 = vrot.slane %v433_v38, 4 }
 0x247   : > { %v449_v40 = vpop.xlane.xlu1 %448 }
 0x248   : > { %v435_v41 = vadd.f32 %v434_v39, %v433_v38  ;;  %v450_v43 = vrot.slane %v449_v40, 4 }
 0x24a   : > { %v436_v44 = vrot.slane %v435_v41, 2  ;;  %v451_v45 = vadd.f32 %v450_v43, %v449_v40 }
 0x24b   : > { %v485_v3 = vpop.permute.xlu1 %484 }
 0x24c   : > { %v452_v46 = vrot.slane %v451_v45, 2  ;;  %v437_v47 = vadd.f32 %v436_v44, %v435_v41  ;;  %v492_v7 = vrot.slane %v485_v3, %v478_v1 }
 0x24e   : > { %v438_v49 = vrot.slane %v437_v47, 1  ;;  %v453_v50 = vadd.f32 %v452_v46, %v451_v45 }
 0x24f   : > { %v503_v20 = vpop.permute.xlu1 %502 }
 0x250   : > { %v439_v52 = vadd.f32 %v438_v49, %v437_v47  ;;  %v454_v53 = vrot.slane %v453_v50, 1 }
 0x252   : > { %814 = vpush %v439_v52  ;;  %v455_v54 = vadd.f32 %v454_v53, %v453_v50 }
 0x253   : > { %v508_v23 = vpop.permute.xlu1 %507 }
 0x254   : > { %816 = vpush %v455_v54 }
 0x283   : > { %s815_s24 = spop %814 }
 0x284   : > { %s457_s25 = smul.f32 0.0009765625, %s815_s24 }
 0x285   : > { %s817_s26 = spop %816 }
 0x286   : > { %s459_s27 = smul.f32 %s457_s25, %s457_s25  ;;  %v465_v2 = vstv %s457_s25 }
 0x287   : > { %s458_s28 = smul.f32 0.0009765625, %s817_s26  ;;  %v466_v5 = vsub.f32 %v996_v31, %v465_v2 }
 0x289   : > { %s460_s29 = ssub.f32 %s458_s28, %s459_s27 }
 0x28b   : > { %s461_s30 = sadd.f32 1e-05, %s460_s29 }
 0x28d   : > { %v462_v56 = vstv %s461_s30 }
 0x28e   : > { %850 = vrsqrt.f32 %v462_v56 }
 0x298   : > { %v851_v57 = vpop.eup %850 }
 0x299   : > { %818 = vpush %v851_v57 }
 0x2ca   : > { %s819_s7 = spop %818 }
 0x2cb   : > { %v467_v58 = vstv %s819_s7 }
 0x2cc   : > { %v468_v59 = vmul.f32 %v467_v58, %v980_v55 }
 0x2ce   : > { %471 = vperm.xlu0 %840, %v468_v59  }
 0x2d2   : > { %845 = vset.pattern.permute.xlu0 %v885_v19 }
 0x34d   : > { %v472_v4 = vpop.permute.xlu0 %471 }
 0x34e   : > { %v479_v6 = vrot.slane %v472_v4, %v478_v1 }
 0x350   : > { %v481_v8 = vmul.f32 %v479_v6, %v466_v5 }
 0x352   : > { %v494_v9 = vadd.f32 %v492_v7, %v481_v8 }
 0x354   : > { %v496_v10 = vcombine.high %v494_v9, %v494_v9  ;;  %v498_v12 = vpack.c.bf16 %v494_v9, %v494_v9 }
 0x356   : > { %v499_v14 = vpack.c.bf16 %v496_v10, %v496_v10  ;;  %v521_v17 = vsel %vm519_vm5, %v498_v12, 0 }
 0x358   : > { %801 = vmatprep.subr.msk.bf16.mxu0 %vm519_vm5, %v499_v14 }
 0x359   : > { %527 = vmatpush1.bf16.msra.mxu0 %v521_v17 }
 0x35c   : > { %802 = vmatmul.mubr.msk.bf16.vlgmr.msra.gmra.mrb[0].mxu0 %vm515_vm6, %v847_v18 }
 0x42f   : > { %v560_v13 = vpop.f32.mrb[0].mxu0 }
 0x430   : > { %v1023_v21 = vadd.f32 %v560_v13, %v503_v20  ;;  %v562_v22 = vpop.f32.mrb[1].mxu0 }
 0x431   : > { %v1025_v24 = vadd.f32 %v562_v22, %v503_v20  ;;  %v564_v25 = vpop.f32.mrb[2].mxu0 }
 0x432   : > { %v1028_v26 = vmul.f32 0.70710677, %v1023_v21  ;;  %v1030_v27 = vadd.f32 %v564_v25, %v508_v23  ;;  %v566_v28 = vpop.f32.mrb[3].mxu0 }
 0x433   : > { %v1033_v29 = vmul.f32 0.70710677, %v1025_v24  ;;  %v1035_v30 = vadd.f32 %v566_v28, %v508_v23 }
 0x434   : > { %v585_v55 = vand.u32 2147483647, %v1028_v26  ;;  %v1039_v32 = vmul.f32 0.70710677, %v1030_v27  ;;  %vm577_vm7 = vcmp.ge.f32.partialorder %v1028_v26, 0.0 }
 0x435   : > { %v586_v15 = vand.u32 2147483647, %v1033_v29  ;;  %v1044_v35 = vmul.f32 0.70710677, %v1035_v30  ;;  %vm578_vm8 = vcmp.ge.f32.partialorder %v1033_v29, 0.0 }
 0x436   : > { %v589_v16 = vmul.f32 0.3275911, %v585_v55  ;;  %v587_v33 = vand.u32 2147483647, %v1039_v32  ;;  %v637_v43 = vsub.f32 0.0, %v585_v55  ;;  %vm579_vm9 = vcmp.ge.f32.partialorder %v1039_v32, 0.0 }
 0x437   : > { %v590_v34 = vmul.f32 0.3275911, %v586_v15  ;;  %v588_v38 = vand.u32 2147483647, %v1044_v35  ;;  %v638_v44 = vsub.f32 0.0, %v586_v15  ;;  %vm580_vm10 = vcmp.ge.f32.partialorder %v1044_v35, 0.0 }
 0x438   : > { %v593_v36 = vadd.f32 1.0, %v589_v16  ;;  %v591_v37 = vmul.f32 0.3275911, %v587_v33  ;;  %v641_v46 = vmul.f32 %v637_v43, %v585_v55  ;;  %v639_v47 = vsub.f32 0.0, %v587_v33 }
 0x439   : > { %v594_v0 = vadd.f32 1.0, %v590_v34  ;;  %v592_v40 = vmul.f32 0.3275911, %v588_v38  ;;  %v642_v49 = vmul.f32 %v638_v44, %v586_v15  ;;  %v640_v51 = vsub.f32 0.0, %v588_v38 }
 0x43a   : > { %852 = vrcp.f32 %v593_v36  ;;  %v595_v39 = vadd.f32 1.0, %v591_v37  ;;  %v645_v56 = vmul.f32 1.442695, %v641_v46  ;;  %v643_v57 = vmul.f32 %v639_v47, %v587_v33 }
 0x43b   : > { %854 = vrcp.f32 %v594_v0  ;;  %v596_v41 = vadd.f32 1.0, %v592_v40  ;;  %v647_v59 = vmul.f32 1.442695, %v642_v49  ;;  %v644_v62 = vmul.f32 %v640_v51, %v588_v38 }
 0x43c   : > { %856 = vrcp.f32 %v595_v39  ;;  %v649_v4 = vmul.f32 1.442695, %v643_v57  ;;  %v886_v46 = vmov -1.0  }
 0x43d   : > { %858 = vrcp.f32 %v596_v41  ;;  %v651_v9 = vmul.f32 1.442695, %v644_v62  ;;  %v581_v47 = vsel %vm577_vm7, 1.0, %v886_v46  ;;  %v582_v26 = vsel %vm578_vm8, 1.0, %v886_v46 }
 0x43e   : > { %860 = vpow2.f32 %v645_v56  ;;  %v583_v29 = vsel %vm579_vm9, 1.0, %v886_v46 }
 0x43f   : > { %862 = vpow2.f32 %v647_v59  ;;  %v569_v59 = vmul.f32 0.5, %v1023_v21  ;;  %v260_v21 = vld [vmem:[%s1072_s5] sm:$0x3] }
 0x440   : > { %864 = vpow2.f32 %v649_v4 }
 0x441   : > { %866 = vpow2.f32 %v651_v9 }
 0x444   : > { %v853_v45 = vpop.eup %852 }
 0x445   : > { %v855_v48 = vpop.eup %854  ;;  %v601_v50 = vmul.f32 1.0614054, %v853_v45 }
 0x446   : > { %v602_v52 = vmul.f32 1.0614054, %v855_v48  ;;  %v857_v54 = vpop.eup %856 }
 0x447   : > { %v605_v53 = vadd.f32 -1.4531521, %v601_v50  ;;  %v603_v42 = vmul.f32 1.0614054, %v857_v54  ;;  %v859_v61 = vpop.eup %858 }
 0x448   : > { %v606_v58 = vadd.f32 -1.4531521, %v602_v52  ;;  %v604_v1 = vmul.f32 1.0614054, %v859_v61  ;;  %v861_v33 = vpop.eup %860 }
 0x449   : > { %v609_v60 = vmul.f32 %v853_v45, %v605_v53  ;;  %v607_v2 = vadd.f32 -1.4531521, %v603_v42  ;;  %v863_v36 = vpop.eup %862  ;;  %v584_v42 = vsel %vm580_vm10, 1.0, %v886_v46 }
 0x44a   : > { %v610_v63 = vmul.f32 %v855_v48, %v606_v58  ;;  %v608_v6 = vadd.f32 -1.4531521, %v604_v1  ;;  %v865_v44 = vpop.eup %864  ;;  %v572_v1 = vmul.f32 0.5, %v1035_v30 }
 0x44b   : > { %v613_v3 = vadd.f32 1.4214138, %v609_v60  ;;  %v611_v7 = vmul.f32 %v857_v54, %v607_v2  ;;  %v867_v51 = vpop.eup %866  ;;  %v571_v60 = vmul.f32 0.5, %v1030_v27  ;;  %v677_v27 = vpop.permute.xlu1 %676 }
 0x44c   : > { %v614_v5 = vadd.f32 1.4214138, %v610_v63  ;;  %v612_v12 = vmul.f32 %v859_v61, %v608_v6  ;;  %v570_v63 = vmul.f32 0.5, %v1025_v24 }
 0x44d   : > { %v617_v8 = vmul.f32 %v853_v45, %v613_v3  ;;  %v615_v14 = vadd.f32 1.4214138, %v611_v7 }
 0x44e   : > { %v618_v10 = vmul.f32 %v855_v48, %v614_v5  ;;  %v616_v11 = vadd.f32 1.4214138, %v612_v12 }
 0x44f   : > { %v621_v17 = vadd.f32 -0.28449672, %v617_v8  ;;  %v619_v19 = vmul.f32 %v857_v54, %v615_v14  ;;  %v726_v8 = vpop.permute.xlu1 %725 }
 0x450   : > { %v622_v18 = vadd.f32 -0.28449672, %v618_v10  ;;  %v620_v22 = vmul.f32 %v859_v61, %v616_v11 }
 0x451   : > { %v625_v20 = vmul.f32 %v853_v45, %v621_v17  ;;  %v623_v23 = vadd.f32 -0.28449672, %v619_v19 }
 0x452   : > { %v626_v13 = vmul.f32 %v855_v48, %v622_v18  ;;  %v624_v55 = vadd.f32 -0.28449672, %v620_v22 }
 0x453   : > { %v629_v25 = vadd.f32 0.2548296, %v625_v20  ;;  %v627_v15 = vmul.f32 %v857_v54, %v623_v23 }
 0x454   : > { %v630_v28 = vadd.f32 0.2548296, %v626_v13  ;;  %v628_v37 = vmul.f32 %v859_v61, %v624_v55 }
 0x455   : > { %v633_v16 = vmul.f32 %v853_v45, %v629_v25  ;;  %v631_v0 = vadd.f32 0.2548296, %v627_v15 }
 0x456   : > { %v634_v34 = vmul.f32 %v855_v48, %v630_v28  ;;  %v632_v40 = vadd.f32 0.2548296, %v628_v37 }
 0x457   : > { %v653_v38 = vmul.f32 %v861_v33, %v633_v16  ;;  %v635_v41 = vmul.f32 %v857_v54, %v631_v0 }
 0x458   : > { %v654_v39 = vmul.f32 %v863_v36, %v634_v34  ;;  %v636_v45 = vmul.f32 %v859_v61, %v632_v40 }
 0x459   : > { %v657_v43 = vsub.f32 1.0, %v653_v38  ;;  %v655_v48 = vmul.f32 %v865_v44, %v635_v41 }
 0x45a   : > { %v658_v49 = vsub.f32 1.0, %v654_v39  ;;  %v656_v52 = vmul.f32 %v867_v51, %v636_v45 }
 0x45b   : > { %v661_v50 = vmul.f32 %v657_v43, %v581_v47  ;;  %v659_v56 = vsub.f32 1.0, %v655_v48 }
 0x45c   : > { %v662_v53 = vmul.f32 %v658_v49, %v582_v26  ;;  %v660_v57 = vsub.f32 1.0, %v656_v52 }
 0x45d   : > { %v663_v54 = vmul.f32 %v659_v56, %v583_v29  ;;  %v665_v58 = vadd.f32 1.0, %v661_v50 }
 0x45e   : > { %v664_v32 = vmul.f32 %v660_v57, %v584_v42  ;;  %v666_v61 = vadd.f32 1.0, %v662_v53 }
 0x45f   : > { %v667_v62 = vadd.f32 1.0, %v663_v54  ;;  %v669_v2 = vmul.f32 %v665_v58, %v569_v59 }
 0x460   : > { %v668_v35 = vadd.f32 1.0, %v664_v32  ;;  %v670_v4 = vmul.f32 %v666_v61, %v570_v63 }
 0x461   : > { %v671_v3 = vmul.f32 %v667_v62, %v571_v60 }
 0x462   : > { %v672_v5 = vmul.f32 %v668_v35, %v572_v1 }
 0x463   : > { %v673_v6 = vpack.c.bf16 %v671_v3, %v669_v2 }
 0x464   : > { %v674_v7 = vpack.c.bf16 %v672_v5, %v670_v4 }
 0x466   : > { %683 = vmatprep.subr.bf16.mxu1 %v674_v7 }
 0x467   : > { %684 = vmatpush1.bf16.msra.mxu1 %v673_v6 }
 0x46a   : > { %803 = vmatmul.mubr.msk.bf16.vlgmr.msra.gmra.mrb[0].mxu1 %vm679_vm11, %v260_v21 }
 0x53d   : > { %v717_v24 = vpop.f32.mrb[0].mxu1 }
 0x53e   : > { %v718_v30 = vadd.f32 %v717_v24, %v677_v27  ;;  %v719_v9 = vpop.f32.mrb[1].mxu1 }
 0x53f   : > { %v720_v10 = vadd.f32 %v719_v9, %v677_v27  ;;  %v721_v12 = vpop.f32.mrb[2].mxu1 }
 0x540   : > { %v728_v14 = vmul.f32 %v726_v8, %v718_v30  ;;  %v722_v17 = vpop.f32.mrb[3].mxu1 }
 0x541   : > { %v729_v18 = vmul.f32 %v726_v8, %v720_v10 }
 0x543   : > { %v732_v11 = vcombine.low %v728_v14, %v729_v18 }
 0x545   : > { %v734_v19 = vadd.f32 %v732_v11, %v996_v31 }
 0x547   : > { %735 = vst [vmem:[%s251_s18] sm:$0xff] %v734_v19 }
 0x548 PF: > { %s16_s21 = sadd.s32 1, %s874_s21  }
 0x549   : > { %p13_p4 = scmp.ge.s32.totalorder %s16_s21, 4  }
 0x54b   :  { %15 = sbr.rel (!%p13_p4) target bundleno = 1 (0x1), region = 74 }

</bundles_post_ra>
